<compile_context>
chip_gen: v7x
topology: tpu7x:2x2x1
jax: 0.10.0
libtpu: 0.0.40
codegen_flags: <defaults>
</compile_context>

<pallas_src>
import functools

import jax
import jax.numpy as jnp
import numpy as np
from jax.experimental import pallas as pl
from jax.experimental.pallas import tpu as pltpu


# ----------------------------- Pallas kernel -------------------------------

def _critic_head_kernel(x_ref, w1_ref, b1_ref, w2_ref, b2_ref, w3_ref, b3_ref,
                        o_ref):
    # x_ref : (tm, F)   rows = batch tile, lanes = features
    # w1_ref: (H, F)    b1_ref: (H, 1)
    # w2_ref: (H, H)    b2_ref: (H, 1)
    # w3_ref: (H, 1)    b3_ref: (1,)   (SMEM scalar)
    # o_ref : (1, 1, tm)  lane-dense value row for this batch tile
    xt = x_ref[...].T                                      # (F, tm) XLU transpose
    h1 = jnp.tanh(
        jnp.dot(w1_ref[...], xt, preferred_element_type=jnp.float32)
        + b1_ref[...])                                     # (H, tm)
    h2 = jnp.tanh(
        jnp.dot(w2_ref[...], h1, preferred_element_type=jnp.float32)
        + b2_ref[...])                                     # (H, tm)
    # Final out_dim=1 layer: elementwise mul + sublane reduce (VPU/XLU),
    # keeps the tiny N=1 matmul off the MXU and yields a lane-dense (1, tm) row.
    v = jnp.sum(h2 * w3_ref[...], axis=0, keepdims=True) + b3_ref[0]  # (1, tm)
    o_ref[...] = v.reshape(1, 1, -1).astype(o_ref.dtype)


@functools.partial(jax.jit, static_argnames=("block_rows",))
def _critic_head_pallas(x, w1, b1, w2, b2, w3, b3, *, block_rows):
    Bp, F = x.shape
    H = w1.shape[0]
    grid_rows = Bp // block_rows

    return pl.pallas_call(
        _critic_head_kernel,
        out_shape=jax.ShapeDtypeStruct((grid_rows, 1, block_rows), jnp.float32),
        grid_spec=pltpu.PrefetchScalarGridSpec(
            num_scalar_prefetch=0,
            grid=(grid_rows,),
            in_specs=[
                pl.BlockSpec((block_rows, F), lambda i: (i, 0)),   # x tile
                pl.BlockSpec((H, F), lambda i: (0, 0)),            # w1 (resident)
                pl.BlockSpec((H, 1), lambda i: (0, 0)),            # b1
                pl.BlockSpec((H, H), lambda i: (0, 0)),            # w2
                pl.BlockSpec((H, 1), lambda i: (0, 0)),            # b2
                pl.BlockSpec((H, 1), lambda i: (0, 0)),            # w3 (column)
                pl.BlockSpec(memory_space=pltpu.MemorySpace.SMEM), # b3 scalar
            ],
            out_specs=pl.BlockSpec((1, 1, block_rows), lambda i: (i, 0, 0)),
        ),
        compiler_params=pltpu.CompilerParams(
            dimension_semantics=("parallel",)),
    )(x, w1, b1, w2, b2, w3, b3)


# ------------------------------ glue / params ------------------------------

def _round_up(n, m):
    return ((n + m - 1) // m) * m


def _choose_block_rows(B):
    """Large lane-aligned row tiles; aim for >=2 grid steps (v7x megacore)."""
    target = max(128, -(-B // 2))          # ~half the batch -> >=2 steps when possible
    target = _round_up(target, 128)        # lane-dense output tile
    return min(1024, target)               # 1024x32 f32 = 128 KiB, safe in VMEM everywhere


def _orthogonal(key, rows, cols, gain):
    """Deterministic orthogonal init (same spirit as torch.nn.init.orthogonal_)."""
    flat_rows, flat_cols = (rows, cols) if rows >= cols else (cols, rows)
    a = jax.random.normal(key, (flat_rows, flat_cols), dtype=jnp.float32)
    q, r = jnp.linalg.qr(a)
    d = jnp.sign(jnp.diagonal(r))
    q = q * d[None, :]
    if rows < cols:
        q = q.T
    return (gain * q[:rows, :cols]).astype(jnp.float32)


def init_critic_head_params(key, feature_dim, hidden_layer_size):
    """Weights kept in PyTorch (out, in) orientation; biases as (H, 1) columns."""
    k1, k2, k3 = jax.random.split(key, 3)
    std = float(np.sqrt(2.0))
    w1 = _orthogonal(k1, hidden_layer_size, feature_dim, std)          # (H, F)
    b1 = jnp.zeros((hidden_layer_size, 1), jnp.float32)
    w2 = _orthogonal(k2, hidden_layer_size, hidden_layer_size, std)    # (H, H)
    b2 = jnp.zeros((hidden_layer_size, 1), jnp.float32)
    w3 = _orthogonal(k3, 1, hidden_layer_size, 1.0).T                  # (H, 1)
    b3 = jnp.zeros((1,), jnp.float32)
    return dict(w1=w1, b1=b1, w2=w2, b2=b2, w3=w3, b3=b3)


def critic_head_forward(features, params):
    """features: [*batch, feature_dim] -> values: [*batch]  (float32)."""
    *batch_dims, F = features.shape
    x = features.reshape(-1, F).astype(jnp.float32)
    B = x.shape[0]

    block_rows = _choose_block_rows(B)
    Bp = _round_up(max(B, 1), block_rows)   # pad UP to a multiple of the tile
    if Bp != B:
        x = jnp.pad(x, ((0, Bp - B), (0, 0)))

    out = _critic_head_pallas(
        x, params["w1"], params["b1"], params["w2"], params["b2"],
        params["w3"], params["b3"], block_rows=block_rows)   # (G, 1, block_rows)
    vals = out.reshape(-1)[:B]
    return vals.reshape(tuple(batch_dims))


def critic_head_reference(features, params):
    x = features.astype(jnp.float32)
    h1 = jnp.tanh(x @ params["w1"].T + params["b1"][:, 0])
    h2 = jnp.tanh(h1 @ params["w2"].T + params["b2"][:, 0])
    v = h2 @ params["w3"] + params["b3"]          # (..., 1)
    return jnp.squeeze(v, axis=-1)


# ---------------------------------- main ------------------------------------

if __name__ == "__main__":
    key = jax.random.PRNGKey(0)
    k_param, k_feat = jax.random.split(key)

    feature_dim = 32
    hidden_layer_size = 32
    batch, seq_len = 2, 8  # exercises get_seq_value path: [batch, seq, feature]

    params = init_critic_head_params(k_param, feature_dim, hidden_layer_size)
    features = jax.random.normal(
        k_feat, (batch, seq_len, feature_dim), dtype=jnp.float32)

    values = critic_head_forward(features, params)      # [batch, seq_len]
    values = jax.block_until_ready(values)

    ref = critic_head_reference(features, params)
    assert values.shape == (batch, seq_len), values.shape
    np.testing.assert_allclose(np.asarray(values), np.asarray(ref),
                               rtol=1e-5, atol=1e-5)
    print("KERNEL_OK")
</pallas_src>

<mosaic_0001>
module attributes {stable_mosaic.version = 11 : i64} {
  func.func @_critic_head_kernel(%arg0: i32, %arg1: memref<128x32xf32, #tpu.memory_space<vmem>>, %arg2: memref<32x32xf32, #tpu.memory_space<vmem>>, %arg3: memref<32x1xf32, #tpu.memory_space<vmem>>, %arg4: memref<32x32xf32, #tpu.memory_space<vmem>>, %arg5: memref<32x1xf32, #tpu.memory_space<vmem>>, %arg6: memref<32x1xf32, #tpu.memory_space<vmem>>, %arg7: memref<1xf32, #tpu.memory_space<smem>>, %arg8: memref<1x1x128xf32, #tpu.memory_space<vmem>>) attributes {dimension_semantics = [#tpu.dimension_semantics<parallel>], iteration_bounds = array<i64: 1>, scalar_prefetch = 0 : i64, scratch_operands = 0 : i64, tpu.core_type = #tpu.core_type<tc>, window_params = [{transform_indices = @transform_0, window_bounds = array<i64: 128, 32>}, {pipeline_mode = #tpu.pipeline_mode<synchronous>, transform_indices = @transform_1, window_bounds = array<i64: 32, 32>}, {pipeline_mode = #tpu.pipeline_mode<synchronous>, transform_indices = @transform_2, window_bounds = array<i64: 32, 1>}, {pipeline_mode = #tpu.pipeline_mode<synchronous>, transform_indices = @transform_3, window_bounds = array<i64: 32, 32>}, {pipeline_mode = #tpu.pipeline_mode<synchronous>, transform_indices = @transform_4, window_bounds = array<i64: 32, 1>}, {pipeline_mode = #tpu.pipeline_mode<synchronous>, transform_indices = @transform_5, window_bounds = array<i64: 32, 1>}, {transform_indices = @transform_6, window_bounds = array<i64: 1>}, {transform_indices = @transform_7, window_bounds = array<i64: 1, 1, 128>}]} {
    %c0 = arith.constant 0 : index
    %c0_0 = arith.constant 0 : index
    %0 = vector.load %arg1[%c0, %c0_0] : memref<128x32xf32, #tpu.memory_space<vmem>>, vector<128x32xf32>
    %1 = tpu.transpose %0, [1, 0] : vector<128x32xf32> -> vector<32x128xf32>
    %c0_1 = arith.constant 0 : index
    %c0_2 = arith.constant 0 : index
    %2 = vector.load %arg2[%c0_1, %c0_2] : memref<32x32xf32, #tpu.memory_space<vmem>>, vector<32x32xf32>
    %cst = arith.constant dense<0.000000e+00> : vector<32x128xf32>
    %3 = tpu.matmul %2, %1, %cst {dimension_numbers = #tpu.dot_dimension_numbers<[1], [0], [0], [1], [0, 0, 1, 1], [], []>} : vector<32x32xf32>, vector<32x128xf32>, vector<32x128xf32> -> vector<32x128xf32>
    %c0_3 = arith.constant 0 : index
    %c0_4 = arith.constant 0 : index
    %4 = vector.load %arg3[%c0_3, %c0_4] : memref<32x1xf32, #tpu.memory_space<vmem>>, vector<32x1xf32>
    %5 = vector.broadcast %4 : vector<32x1xf32> to vector<32x128xf32>
    %6 = arith.addf %3, %5 : vector<32x128xf32>
    %7 = math.tanh %6 : vector<32x128xf32>
    %c0_5 = arith.constant 0 : index
    %c0_6 = arith.constant 0 : index
    %8 = vector.load %arg4[%c0_5, %c0_6] : memref<32x32xf32, #tpu.memory_space<vmem>>, vector<32x32xf32>
    %cst_7 = arith.constant dense<0.000000e+00> : vector<32x128xf32>
    %9 = tpu.matmul %8, %7, %cst_7 {dimension_numbers = #tpu.dot_dimension_numbers<[1], [0], [0], [1], [0, 0, 1, 1], [], []>} : vector<32x32xf32>, vector<32x128xf32>, vector<32x128xf32> -> vector<32x128xf32>
    %c0_8 = arith.constant 0 : index
    %c0_9 = arith.constant 0 : index
    %10 = vector.load %arg5[%c0_8, %c0_9] : memref<32x1xf32, #tpu.memory_space<vmem>>, vector<32x1xf32>
    %11 = vector.broadcast %10 : vector<32x1xf32> to vector<32x128xf32>
    %12 = arith.addf %9, %11 : vector<32x128xf32>
    %13 = math.tanh %12 : vector<32x128xf32>
    %c0_10 = arith.constant 0 : index
    %c0_11 = arith.constant 0 : index
    %14 = vector.load %arg6[%c0_10, %c0_11] : memref<32x1xf32, #tpu.memory_space<vmem>>, vector<32x1xf32>
    %15 = vector.broadcast %14 : vector<32x1xf32> to vector<32x128xf32>
    %16 = arith.mulf %13, %15 : vector<32x128xf32>
    %cst_12 = arith.constant dense<0.000000e+00> : vector<128xf32>
    %17 = vector.multi_reduction <add>, %16, %cst_12 [0] : vector<32x128xf32> to vector<128xf32>
    %18 = vector.shape_cast %17 : vector<128xf32> to vector<1x128xf32>
    %c0_13 = arith.constant 0 : index
    %19 = memref.load %arg7[%c0_13] : memref<1xf32, #tpu.memory_space<smem>>
    %20 = vector.broadcast %19 : f32 to vector<1x128xf32>
    %21 = arith.addf %18, %20 : vector<1x128xf32>
    %22 = vector.shape_cast %21 : vector<1x128xf32> to vector<1x1x128xf32>
    %c0_14 = arith.constant 0 : index
    %c0_15 = arith.constant 0 : index
    %c0_16 = arith.constant 0 : index
    %23 = vector.load %arg8[%c0_14, %c0_15, %c0_16] : memref<1x1x128xf32, #tpu.memory_space<vmem>>, vector<1x1x128xf32>
    tpu.vector_store %arg8[%c0_14, %c0_15, %c0_16], %22 {strides = array<i32>} : memref<1x1x128xf32, #tpu.memory_space<vmem>>, vector<1x1x128xf32>,
    return
  }
  func.func @transform_0(%arg0: i32) -> (i32, i32) {
    %c0_i32 = arith.constant 0 : i32
    %c0_i32_0 = arith.constant 0 : i32
    return %arg0, %c0_i32 : i32, i32
  }
  func.func @transform_1(%arg0: i32) -> (i32, i32) {
    %c0_i32 = arith.constant 0 : i32
    %c0_i32_0 = arith.constant 0 : i32
    %c0_i32_1 = arith.constant 0 : i32
    return %c0_i32, %c0_i32_0 : i32, i32
  }
  func.func @transform_2(%arg0: i32) -> (i32, i32) {
    %c0_i32 = arith.constant 0 : i32
    %c0_i32_0 = arith.constant 0 : i32
    %c0_i32_1 = arith.constant 0 : i32
    return %c0_i32, %c0_i32_0 : i32, i32
  }
  func.func @transform_3(%arg0: i32) -> (i32, i32) {
    %c0_i32 = arith.constant 0 : i32
    %c0_i32_0 = arith.constant 0 : i32
    %c0_i32_1 = arith.constant 0 : i32
    return %c0_i32, %c0_i32_0 : i32, i32
  }
  func.func @transform_4(%arg0: i32) -> (i32, i32) {
    %c0_i32 = arith.constant 0 : i32
    %c0_i32_0 = arith.constant 0 : i32
    %c0_i32_1 = arith.constant 0 : i32
    return %c0_i32, %c0_i32_0 : i32, i32
  }
  func.func @transform_5(%arg0: i32) -> (i32, i32) {
    %c0_i32 = arith.constant 0 : i32
    %c0_i32_0 = arith.constant 0 : i32
    %c0_i32_1 = arith.constant 0 : i32
    return %c0_i32, %c0_i32_0 : i32, i32
  }
  func.func @transform_6(%arg0: i32) -> i32 {
    %c0_i32 = arith.constant 0 : i32
    %c0_i32_0 = arith.constant 0 : i32
    return %c0_i32 : i32
  }
  func.func @transform_7(%arg0: i32) -> (i32, i32, i32) {
    %c0_i32 = arith.constant 0 : i32
    %c0_i32_0 = arith.constant 0 : i32
    %c0_i32_1 = arith.constant 0 : i32
    return %arg0, %c0_i32, %c0_i32_0 : i32, i32, i32
  }
}

</mosaic_0001>

<bundles_post_ra>
// kernel: _critic_head_pallas.1
= control target key start
LH: loop header
LB: loop body
LE: loop exit
PB: predicated region body
PF: predicated region fallthrough
CT: control target
= control target key end

     0   :  { %vm72_vm0 = vcmask 261120   ;;  %v610_v6 = vmov 0   ;;  %s821_s0 = inlined_call_operand.vmem [shape: f32[128,32], index: 0, kind: input, shape index: {}]   ;;  %s822_s1 = inlined_call_operand.vmem [shape: f32[32,32], index: 1, kind: input, shape index: {}]   ;;  %s823_s2 = inlined_call_operand.vmem [shape: f32[32,1], index: 2, kind: input, shape index: {}]   ;;  %s824_s3 = inlined_call_operand.vmem [shape: f32[32,32], index: 3, kind: input, shape index: {}]   ;;  %s825_s4 = inlined_call_operand.vmem [shape: f32[32,1], index: 4, kind: input, shape index: {}]   ;;  %s826_s5 = inlined_call_operand.vmem [shape: f32[32,1], index: 5, kind: input, shape index: {}]   ;;  %s827_s6 = inlined_call_operand.<no memory space> [shape: f32[1], index: 6, kind: input, shape index: {}]   ;;  %s828_s7 = inlined_call_operand.hbm [shape: f32[1,1,128], index: 7, kind: output, shape index: {}]  }
   0x1   :  { %v28_v0 = vld [vmem:[%s821_s0] sm:$0xff]  ;;  %v29_v1 = vld [vmem:[%s821_s0 + $0x8] sm:$0xff]  ;;  %v30_v2 = vld [vmem:[%s821_s0 + $0x10] sm:$0xff]  ;;  %568 = vset.pattern.permute.xlu0 %v610_v6  ;;  %569 = vset.pattern.permute.xlu1 %v610_v6 }
   0x2   :  { %v510_v3 = vpack.c.bf16 %v29_v1, %v28_v0  ;;  %vm663_vm1 = vmpackc.low %vm72_vm0, %vm72_vm0  ;;  %v31_v5 = vld [vmem:[%s821_s0 + $0x18] sm:$0xff]  ;;  %v44_v8 = vld [vmem:[%s822_s1] sm:$0xff] }
   0x3   :  { %v516_v7 = vpack.c.bf16 %v31_v5, %v30_v2  ;;  %v32_v9 = vld [vmem:[%s821_s0 + $0x20] sm:$0xff]  ;;  %v33_v10 = vld [vmem:[%s821_s0 + $0x28] sm:$0xff]  ;;  %490 = vmatprep.mubr.msk.f32.mxu0 %vm72_vm0, %v44_v8  ;;  %v50_v12 = vld [vmem:[%s823_s2 + $0x10] sm:$0xff] }
   0x4   :  { %512 = vmatprep.subr.msk.bf16.mxu0 %vm663_vm1, %v510_v3  ;;  %v48_v11 = vld [vmem:[%s823_s2] sm:$0xff]  ;;  %64 = vperm.xlu1 %569, %v50_v12   ;;  %v522_v13 = vpack.c.bf16 %v33_v10, %v32_v9  ;;  %v49_v14 = vld [vmem:[%s823_s2 + $0x8] sm:$0xff]  ;;  %v51_v15 = vld [vmem:[%s823_s2 + $0x18] sm:$0xff] }
   0x5   :  { %515 = vmatpush3.bf16.xpose.msk.msra.mxu0 %vm663_vm1, %v510_v3  ;;  %54 = vperm.xlu0 %568, %v48_v11  }
   0x6   :  { %518 = vmatprep.subr.msk.bf16.mxu0 %vm663_vm1, %v516_v7 }
   0x7   :  { %13 = vsyncpa [#allocation4], 0  ;;  %v226_v16 = vld [vmem:[%s825_s4] sm:$0xff]  ;;  %v34_v17 = vld [vmem:[%s821_s0 + $0x30] sm:$0xff]  ;;  %s611_s21 = smov [#allocation3]  }
   0x8   :  { %69 = vperm.xlu1 %569, %v51_v15   ;;  %v35_v18 = vld [vmem:[%s821_s0 + $0x38] sm:$0xff]  ;;  %v227_v19 = vld [vmem:[%s825_s4 + $0x8] sm:$0xff]  ;;  %v228_v21 = vld [vmem:[%s825_s4 + $0x10] sm:$0xff]  ;;  %s398_s22 = sshll.u32 %s611_s21, 4  ;;  %s399_s22 = int_to_ptr.vmem [resolvable:$true] %s398_s22 }
   0x9   :  { %59 = vperm.xlu0 %568, %v49_v14   ;;  %v528_v20 = vpack.c.bf16 %v35_v18, %v34_v17  ;;  %v229_v22 = vld [vmem:[%s825_s4 + $0x18] sm:$0xff]  ;;  %v351_v23 = vld [vmem:[%s826_s5] sm:$0xff]  ;;  %v37_v25 = vld [vmem:[%s821_s0 + $0x48] sm:$0xff]  ;;  %s586_s23 = scalar_lea.vmem %s399_s22, 16  ;;  %s590_s24 = scalar_lea.vmem %s399_s22, 32 }
   0xa   :  { %v36_v24 = vld [vmem:[%s821_s0 + $0x40] sm:$0xff]  ;;  %v352_v26 = vld [vmem:[%s826_s5 + $0x8] sm:$0xff]  ;;  %v353_v28 = vld [vmem:[%s826_s5 + $0x10] sm:$0xff]  ;;  %p587_p0 = scmp.ne.s32.totalorder %s399_s22, %s586_s23  ;;  %p591_p1 = scmp.lt.s32.totalorder %s399_s22, %s399_s22 }
   0xb   :  { %v534_v27 = vpack.c.bf16 %v37_v25, %v36_v24  ;;  %v354_v29 = vld [vmem:[%s826_s5 + $0x18] sm:$0xff]  ;;  %v38_v30 = vld [vmem:[%s821_s0 + $0x50] sm:$0xff]  ;;  %v40_v33 = vld [vmem:[%s821_s0 + $0x60] sm:$0xff]  ;;  %p592_p2 = scmp.lt.s32.totalorder %s590_s24, %s586_s23 }
   0xc   :  { %237 = vperm.xlu1 %569, %v227_v19   ;;  %v39_v31 = vld [vmem:[%s821_s0 + $0x58] sm:$0xff]  ;;  %v41_v34 = vld [vmem:[%s821_s0 + $0x68] sm:$0xff]  ;;  %v42_v36 = vld [vmem:[%s821_s0 + $0x70] sm:$0xff] }
   0xd   :  { %521 = vmatpush3.bf16.xpose.msk.msra.mxu0 %vm663_vm1, %v516_v7  ;;  %232 = vperm.xlu0 %568, %v226_v16   ;;  %v540_v32 = vpack.c.bf16 %v39_v31, %v38_v30  ;;  %v546_v35 = vpack.c.bf16 %v41_v34, %v40_v33  ;;  %v43_v37 = vld [vmem:[%s821_s0 + $0x78] sm:$0xff]  ;;  %v45_v39 = vld [vmem:[%s822_s1 + $0x8] sm:$0xff]  ;;  %v46_v40 = vld [vmem:[%s822_s1 + $0x10] sm:$0xff]  ;;  %p593_p3 = por %p592_p2, %p591_p1 }
   0xe   :  { %524 = vmatprep.subr.msk.bf16.mxu0 %vm663_vm1, %v522_v13  ;;  %v552_v38 = vpack.c.bf16 %v43_v37, %v42_v36  ;;  %v47_v41 = vld [vmem:[%s822_s1 + $0x18] sm:$0xff]  ;;  %v222_v42 = vld [vmem:[%s824_s3] sm:$0xff]  ;;  %v223_v61 = vld [vmem:[%s824_s3 + $0x8] sm:$0xff] }
   0xf   :  { %504 = vmatprep.mubr.msk.f32.mxu1 %vm72_vm0, %v222_v42  ;;  %v224_v62 = vld [vmem:[%s824_s3 + $0x10] sm:$0xff]  ;;  %v225_v63 = vld [vmem:[%s824_s3 + $0x18] sm:$0xff]  ;;  %p594_p4 = pnand %p593_p3, %p587_p0 }
  0x10   :  { %247 = vperm.xlu1 %569, %v229_v22  }
  0x11   :  { %242 = vperm.xlu0 %568, %v228_v21  }
  0x14   :  { %362 = vperm.xlu1 %569, %v352_v26  }
  0x15   :  { %527 = vmatpush3.bf16.xpose.msk.msra.mxu0 %vm663_vm1, %v522_v13  ;;  %357 = vperm.xlu0 %568, %v351_v23  }
  0x16   :  { %530 = vmatprep.subr.msk.bf16.mxu0 %vm663_vm1, %v528_v20 }
  0x18   :  { %372 = vperm.xlu1 %569, %v354_v29  }
  0x19   :  { %367 = vperm.xlu0 %568, %v353_v28  }
  0x1d   :  { %533 = vmatpush3.bf16.xpose.msk.msra.mxu0 %vm663_vm1, %v528_v20 }
  0x1e   :  { %536 = vmatprep.subr.msk.bf16.mxu0 %vm663_vm1, %v534_v27 }
  0x25   :  { %539 = vmatpush3.bf16.xpose.msk.msra.mxu0 %vm663_vm1, %v534_v27 }
  0x26   :  { %542 = vmatprep.subr.msk.bf16.mxu0 %vm663_vm1, %v540_v32 }
  0x2d   :  { %545 = vmatpush3.bf16.xpose.msk.msra.mxu0 %vm663_vm1, %v540_v32  ;;  %v389_v32 = vstv %s827_s6 }
  0x2e   :  { %548 = vmatprep.subr.msk.bf16.mxu0 %vm663_vm1, %v546_v35 }
  0x35   :  { %551 = vmatpush3.bf16.xpose.msk.msra.mxu0 %vm663_vm1, %v546_v35 }
  0x36   :  { %554 = vmatprep.subr.msk.bf16.mxu0 %vm663_vm1, %v552_v38 }
  0x3d   :  { %557 = vmatpush3.bf16.xpose.msk.msra.mxu0 %vm663_vm1, %v552_v38 }
  0x44   :  { %491 = vmatmul.mubr.msk.f32.vlgmr.msra.gmra.mrb[0].mxu0 %vm72_vm0, %v45_v39 }
  0x45   :  { %493 = vmatprep.mubr.msk.f32.mxu0 %vm72_vm0, %v46_v40 }
  0x48   :  { %494 = vmatmul.mubr.msk.f32.gmra.mrb[2].mxu0 %vm72_vm0, %v47_v41 }
  0x83   :  { %v65_v44 = vpop.permute.xlu1 %64 }
  0x84   :  { %v55_v43 = vpop.permute.xlu0 %54 }
  0x87   :  { %v70_v50 = vpop.permute.xlu1 %69 }
  0x88   :  { %v60_v45 = vpop.permute.xlu0 %59 }
  0x8b   :  { %v238_v0 = vpop.permute.xlu1 %237 }
  0x8c   :  { %v233_v1 = vpop.permute.xlu0 %232 }
  0x8f   :  { %v248_v6 = vpop.permute.xlu1 %247 }
  0x90   :  { %v243_v8 = vpop.permute.xlu0 %242 }
  0x93   :  { %v363_v14 = vpop.permute.xlu1 %362 }
  0x94   :  { %v358_v12 = vpop.permute.xlu0 %357 }
  0x97   :  { %v373_v23 = vpop.permute.xlu1 %372 }
  0x98   :  { %v368_v21 = vpop.permute.xlu0 %367 }
 0x117   :  { %v492_v46 = vpop.f32.mrb[0].mxu0 }
 0x118   :  { %v205_v47 = vadd.f32 %v492_v46, %v60_v45  ;;  %v199_v48 = vpop.f32.mrb[1].mxu0 }
 0x119   :  { %v200_v49 = vadd.f32 %v199_v48, %v55_v43 }
 0x11a   :  { %570 = vtanh.f32 %v205_v47 }
 0x11b   :  { %572 = vtanh.f32 %v200_v49  ;;  %v495_v51 = vpop.f32.mrb[2].mxu0 }
 0x11c   :  { %v215_v52 = vadd.f32 %v495_v51, %v70_v50  ;;  %v209_v53 = vpop.f32.mrb[3].mxu0 }
 0x11d   :  { %v210_v54 = vadd.f32 %v209_v53, %v65_v44 }
 0x11e   :  { %574 = vtanh.f32 %v215_v52 }
 0x11f   :  { %576 = vtanh.f32 %v210_v54 }
 0x124   :  { %v571_v55 = vpop.eup %570 }
 0x125   :  { %v573_v56 = vpop.eup %572 }
 0x126   :  { %v558_v57 = vpack.c.bf16 %v571_v55, %v573_v56 }
 0x128   :  { %v575_v58 = vpop.eup %574  ;;  %559 = vmatprep.subr.bf16.mxu1 %v558_v57 }
 0x129   :  { %v577_v59 = vpop.eup %576  ;;  %561 = vmatpush3.bf16.msra.mxu1 %v558_v57 }
 0x12a   :  { %v562_v60 = vpack.c.bf16 %v575_v58, %v577_v59 }
 0x12c   :  { %563 = vmatprep.subr.bf16.mxu1 %v562_v60 }
 0x12d   :  { %565 = vmatpush3.bf16.msra.mxu1 %v562_v60 }
 0x130   :  { %505 = vmatmul.mubr.msk.f32.vlgmr.msra.gmra.mrb[0].mxu1 %vm72_vm0, %v223_v61 }
 0x131   :  { %507 = vmatprep.mubr.msk.f32.mxu1 %vm72_vm0, %v224_v62 }
 0x134   :  { %508 = vmatmul.mubr.msk.f32.gmra.mrb[2].mxu1 %vm72_vm0, %v225_v63 }
 0x203   :  { %v506_v2 = vpop.f32.mrb[0].mxu1 }
 0x204   :  { %v334_v3 = vadd.f32 %v506_v2, %v238_v0  ;;  %v328_v4 = vpop.f32.mrb[1].mxu1 }
 0x205   :  { %v329_v5 = vadd.f32 %v328_v4, %v233_v1 }
 0x206   :  { %578 = vtanh.f32 %v334_v3 }
 0x207   :  { %580 = vtanh.f32 %v329_v5  ;;  %v509_v7 = vpop.f32.mrb[2].mxu1 }
 0x208   :  { %v344_v9 = vadd.f32 %v509_v7, %v248_v6  ;;  %v338_v10 = vpop.f32.mrb[3].mxu1 }
 0x209   :  { %v339_v11 = vadd.f32 %v338_v10, %v243_v8 }
 0x20a   :  { %582 = vtanh.f32 %v344_v9 }
 0x20b   :  { %584 = vtanh.f32 %v339_v11 }
 0x210   :  { %v579_v13 = vpop.eup %578 }
 0x211   :  { %v581_v15 = vpop.eup %580  ;;  %v376_v16 = vmul.f32 %v579_v13, %v363_v14 }
 0x212   :  { %v375_v17 = vmul.f32 %v581_v15, %v358_v12 }
 0x214   :  { %v583_v18 = vpop.eup %582  ;;  %v379_v19 = vadd.f32 %v376_v16, %v375_v17 }
 0x215   :  { %v585_v20 = vpop.eup %584  ;;  %v378_v24 = vmul.f32 %v583_v18, %v373_v23 }
 0x216   :  { %v377_v22 = vmul.f32 %v585_v20, %v368_v21 }
 0x218   :  { %v380_v25 = vadd.f32 %v379_v19, %v377_v22 }
 0x21a   :  { %v381_v26 = vadd.f32 %v380_v25, %v378_v24 }
 0x21c   :  { %v382_v27 = vrot.slane %v381_v26, 4 }
 0x21e   :  { %v383_v28 = vadd.f32 %v382_v27, %v381_v26 }
 0x220   :  { %v384_v29 = vrot.slane %v383_v28, 2 }
 0x222   :  { %v385_v30 = vadd.f32 %v384_v29, %v383_v28 }
 0x224   :  { %v386_v31 = vrot.slane %v385_v30, 1 }
 0x226   :  { %v387_v33 = vadd.f32 %v386_v31, %v385_v30 }
 0x228   :  { %v390_v34 = vadd.f32 %v389_v32, %v387_v33 }
 0x22a   :  { %391 = vst [vmem:[#allocation3] sm:$0x1] %v390_v34 }
 0x22b   :  { %597 = shalt.err (!%p594_p4)
}
 0x22c   :  { %s598_s26 = scalar_lea.hbm %s828_s7, 16 }
 0x22d   :  { %p599_p5 = scmp.ne.s32.totalorder %s828_s7, %s598_s26  ;;  %p602_p6 = scmp.lt.u32.totalorder %s598_s26, %s828_s7 }
 0x22f   :  { %p604_p7 = pnand %p602_p6, %p599_p5 }
 0x231   :  { %607 = shalt.err (!%p604_p7)
}
 0x232   :  { %401 = dma.vmem_to_hbm [thread:$0]  %s399_s22, 16, %s828_s7, [#allocation4]  }
 0x233   :  { %608 = dma.done.wait [#allocation4], 16  }
 0x234   :  { %609 = vsyncadd [#allocation4], 4294967280 }
 0x235   :  { %405 = vsyncpa [#allocation4], 1 }

</bundles_post_ra>
